<compile_context>
chip_gen: v7x
topology: tpu7x:2x2x1
jax: 0.10.0
libtpu: 0.0.40
codegen_flags: <defaults>
</compile_context>

<pallas_src>
import functools

import jax
import jax.numpy as jnp
from jax.experimental import pallas as pl
from jax.experimental.pallas import tpu as pltpu

# Small-but-consistent shapes (module defaults are DIM=512, SEQ_LEN=32, n_chars=len(charmap)).
DIM = 128
SEQ_LEN = 16
N_CHARS = 32
KSIZE = 5
PAD = 2
N_RESBLOCKS = 5
N_CONVS = 2 * N_RESBLOCKS          # 10 DIMxDIM convs inside the residual stack


# ----------------------------------------------------------------------------------
# Hardware introspection helpers
# ----------------------------------------------------------------------------------
def _tpu_generation():
    """Best-effort TPU generation (5 / 6 / 7); defaults to 6 if unknown."""
    try:
        kind = jax.devices()[0].device_kind.lower()
    except Exception:
        return 6
    if "v7" in kind or "7x" in kind:
        return 7
    if "v6" in kind:
        return 6
    if "v5" in kind:
        return 5
    if "v4" in kind:
        return 5            # treat v4 like v5e (128-deep MXU, small scoped-VMEM default)
    return 6


def _pick_tb(batch, gen):
    """Examples per grid step: M = tb*SEQ_LEN rows per matmul."""
    tb = 16 if gen >= 6 else 8          # M=256 fills v6e/v7x MXU; v5e is full at M=128
    # v7x: a 1-long "parallel" grid leaves one TensorCore idle — prefer >= 2 grid steps.
    if gen >= 7 and tb > 8 and -(-batch // tb) < 2:
        tb = 8
    # Don't pad a tiny batch up to a much larger tile.
    while tb > 8 and batch <= tb // 2:
        tb //= 2
    return tb


def _vmem_limit_bytes(gen, weight_bytes, act_tile_bytes, single_buffer):
    """Explicit scoped-VMEM limit: defaults (16/32 MiB) don't fit the real DIM=512 stack."""
    ceiling = (56 << 20) if gen >= 7 else (100 << 20)   # v7x: 64 MiB physical per TC
    buffered_weights = (1 if single_buffer else 2) * weight_bytes
    needed = buffered_weights + 4 * act_tile_bytes + (8 << 20)   # + working-set slack
    return int(min(ceiling, max(32 << 20, needed)))


# ----------------------------------------------------------------------------------
# pltpu.roll direction probe (per dtype): +1 if pltpu.roll shifts like jnp.roll
# (out[i] = x[i-s]), -1 if opposite, None if neither (caller falls back to f32 rolls).
# Probed in the dtype actually rolled in the kernel, including packed bf16 (odd shift).
# ----------------------------------------------------------------------------------
_ROLL_SIGN_CACHE = {}   # process-global, keyed by dtype name (one tiny device kernel each)


def _roll_sign(dtype):
    key = jnp.dtype(dtype).name
    if key not in _ROLL_SIGN_CACHE:
        x = jax.lax.broadcasted_iota(dtype, (16, 128), 0)   # row index per row; exact in bf16

        def probe_kernel(x_ref, o_ref):
            o_ref[...] = pltpu.roll(x_ref[...], shift=3, axis=0)

        y = pl.pallas_call(
            probe_kernel,
            out_shape=jax.ShapeDtypeStruct((16, 128), dtype),
        )(x)
        if bool(jnp.array_equal(y, jnp.roll(x, 3, axis=0))):
            sign = 1
        elif bool(jnp.array_equal(y, jnp.roll(x, -3, axis=0))):
            sign = -1
        else:
            sign = None
        _ROLL_SIGN_CACHE[key] = sign
    return _ROLL_SIGN_CACHE[key]


# ----------------------------------------------------------------------------------
# Kernel: one grid step == tb batch elements, flattened to (tb*SEQ_LEN, DIM).
# ----------------------------------------------------------------------------------
def _discriminator_kernel(y0_ref, wres_ref, bres_ref, wlin_ref, out_ref, *,
                          roll_sign, use_im2col, mask_in_mm_dtype):
    """
    y0_ref   : (tb*SEQ_LEN, DIM) f32    output of the hoisted 1x1 conv (charmap -> DIM)
    wres_ref : im2col  -> (N_CONVS, KSIZE*DIM, DIM)  matmul dtype
               per-tap -> (N_CONVS, KSIZE, DIM, DIM) matmul dtype
    bres_ref : (N_CONVS, 1, DIM) f32
    wlin_ref : (SEQ_LEN, DIM) f32       linear weight (channel-major flatten folded in)
    out_ref  : (tb, 1) f32              one logit (minus blin) per example
    """
    rows = y0_ref.shape[0]
    tb = rows // SEQ_LEN
    mm_dtype = wres_ref.dtype

    y = y0_ref[...]                                                 # (rows, DIM) f32

    # Per-tap validity masks: flat row t sits at sequence position (t % SEQ_LEN); tap
    # offset d = k - PAD is valid iff 0 <= pos + d < SEQ_LEN.  This reproduces the
    # per-sequence zero padding on the flattened batch axis (no cross-example leakage,
    # wrap-around rows from the roll are masked).
    pos = jax.lax.broadcasted_iota(jnp.int32, (rows, 1), 0) % SEQ_LEN
    masks = [((pos + (k - PAD)) >= 0) & ((pos + (k - PAD)) < SEQ_LEN)
             for k in range(KSIZE)]

    def taps(h):
        """5 shifted + masked copies of h, each in the matmul operand dtype."""
        if mask_in_mm_dtype:
            # bf16-VPU generations: cast once, roll/select on the bf16 copy (5x fewer casts).
            h = h.astype(mm_dtype)
        out = []
        for k in range(KSIZE):
            if k == PAD:
                c = h                                               # zero shift, all-valid
            else:
                shift = (roll_sign * (PAD - k)) % rows
                shifted = pltpu.roll(h, shift=shift, axis=0)        # XLU, not VALU
                c = jnp.where(masks[k], shifted, 0.0)
            out.append(c if mask_in_mm_dtype else c.astype(mm_dtype))
        return out

    def conv5(h, idx):
        t = taps(h)
        if use_im2col:
            # One (rows, KSIZE*DIM) @ (KSIZE*DIM, DIM) MXU matmul (pays off when DIM < 256).
            im2col = jnp.concatenate(t, axis=1)
            acc = jnp.dot(im2col, wres_ref[idx], preferred_element_type=jnp.float32)
        else:
            # Per-tap accumulation: identical MXU passes at DIM>=256 (and always on v5e),
            # no im2col copy traffic / VMEM live-range pressure.
            acc = jnp.dot(t[0], wres_ref[idx, 0], preferred_element_type=jnp.float32)
            for k in range(1, KSIZE):
                acc = acc + jnp.dot(t[k], wres_ref[idx, k],
                                    preferred_element_type=jnp.float32)
        return acc + bres_ref[idx]                                  # (1, DIM) broadcasts

    # 5 x ResBlockD:  y = y + 0.3 * conv5(relu(conv5(relu(y))))   (residual math in f32)
    for blk in range(N_RESBLOCKS):
        h = conv5(jnp.maximum(y, 0.0), 2 * blk)
        h = conv5(jnp.maximum(h, 0.0), 2 * blk + 1)
        y = y + 0.3 * h

    # linear(SEQ_LEN*DIM -> 1): PyTorch's channel-major flatten is folded into wlin, which
    # is broadcast over the tb examples in this tile (no tb-times tiling in HBM/VMEM).
    prod = y.reshape(tb, SEQ_LEN, DIM) * wlin_ref[...]              # (tb, SEQ_LEN, DIM) f32
    per_ex = jnp.sum(jnp.sum(prod, axis=2), axis=1, keepdims=True)  # (tb, 1)
    out_ref[...] = per_ex


# ----------------------------------------------------------------------------------
# Wrapper
# ----------------------------------------------------------------------------------
@functools.partial(jax.jit, static_argnames=(
    "tb", "matmul_dtype", "roll_sign", "use_im2col", "mask_in_mm",
    "single_buffer", "vmem_limit"))
def _forward_jit(x, params, *, tb, matmul_dtype, roll_sign, use_im2col,
                 mask_in_mm, single_buffer, vmem_limit):
    B = x.shape[0]
    pad_b = (-B) % tb
    if pad_b:
        x = jnp.concatenate([x, jnp.zeros((pad_b,) + x.shape[1:], x.dtype)], axis=0)
    bp = B + pad_b
    n_tiles = bp // tb
    rows = tb * SEQ_LEN

    # Hoisted 1x1 conv (K = N_CHARS is too shallow for the MXU-heavy kernel body).
    # TODO(synk): if profiling shows the y0 DMA exposed, ship y0 to the kernel in bf16.
    y0 = (x.reshape(bp * SEQ_LEN, N_CHARS).astype(jnp.float32) @ params["w1"]
          + params["b1"])                                           # (bp*SEQ_LEN, DIM) f32

    wres = params["wres"].astype(matmul_dtype)                      # (N_CONVS,KSIZE,DIM,DIM)
    if use_im2col:
        wres = wres.reshape(N_CONVS, KSIZE * DIM, DIM)              # im2col weight layout
    bres = params["bres"].astype(jnp.float32)
    wlin = params["wlin_kernel"].astype(jnp.float32)                # (SEQ_LEN, DIM), untiled

    w_bytes = wres.size * wres.dtype.itemsize
    cost = pl.CostEstimate(
        flops=2 * bp * SEQ_LEN * (KSIZE * DIM) * DIM * N_CONVS,
        transcendentals=0,
        bytes_accessed=int(y0.size * 4 + w_bytes + bres.size * 4 + wlin.size * 4 + bp * 4),
    )

    def const_spec(shape):
        # Constant index_map -> block stays VMEM-resident across the whole grid.
        idx = lambda *_: (0,) * len(shape)
        if single_buffer:
            try:
                # Weights never change across the grid: single-buffer them so the real
                # DIM=512 stack (~26 MiB bf16) isn't double-buffered into v7x's 64 MiB VMEM.
                return pl.BlockSpec(shape, idx, pipeline_mode=pl.Buffered(1))
            except (TypeError, AttributeError):   # jax without BlockSpec.pipeline_mode
                pass
        return pl.BlockSpec(shape, idx)

    kernel = functools.partial(_discriminator_kernel, roll_sign=roll_sign,
                               use_im2col=use_im2col, mask_in_mm_dtype=mask_in_mm)

    out = pl.pallas_call(
        kernel,
        out_shape=jax.ShapeDtypeStruct((bp, 1), jnp.float32),
        grid_spec=pltpu.PrefetchScalarGridSpec(
            num_scalar_prefetch=0,
            grid=(n_tiles,),
            in_specs=[
                pl.BlockSpec((rows, DIM), lambda b: (b, 0)),        # activations: per-tile
                const_spec(wres.shape),                             # weights: VMEM-resident
                const_spec(bres.shape),
                const_spec(wlin.shape),
            ],
            out_specs=pl.BlockSpec((tb, 1), lambda b: (b, 0)),
        ),
        compiler_params=pltpu.CompilerParams(
            dimension_semantics=("parallel",),
            vmem_limit_bytes=vmem_limit,
        ),
        cost_estimate=cost,
    )(y0, wres, bres, wlin)

    return out[:B] + params["blin"]


def discriminator_forward(x, params, *, tb=None, matmul_dtype=jnp.bfloat16):
    gen = _tpu_generation()
    B = x.shape[0]
    if tb is None:
        tb = _pick_tb(B, gen)

    # im2col concat only where it saves MXU passes (shallow DIM on 256-wide MXUs).
    use_im2col = (gen >= 6) and (DIM < 256)
    # Cast-before-roll/select only on bf16-capable VPUs and only for sub-f32 matmul dtypes.
    mask_in_mm = (gen >= 6) and (jnp.dtype(matmul_dtype) != jnp.dtype(jnp.float32))

    roll_dtype = matmul_dtype if mask_in_mm else jnp.float32
    roll_sign = _roll_sign(roll_dtype)
    if roll_sign is None:
        # Packed-dtype sublane roll didn't behave as expected; fall back to f32 rolls.
        mask_in_mm = False
        roll_sign = _roll_sign(jnp.float32)
    if roll_sign is None:
        raise RuntimeError("pltpu.roll probe failed for float32; cannot build conv taps")

    weight_bytes = N_CONVS * KSIZE * DIM * DIM * jnp.dtype(matmul_dtype).itemsize
    single_buffer = weight_bytes > (8 << 20)        # only matters at the real DIM=512 stack
    act_tile_bytes = tb * SEQ_LEN * DIM * 4
    vmem_limit = _vmem_limit_bytes(gen, weight_bytes, act_tile_bytes, single_buffer)

    return _forward_jit(x, params, tb=tb, matmul_dtype=matmul_dtype,
                        roll_sign=roll_sign, use_im2col=use_im2col,
                        mask_in_mm=mask_in_mm, single_buffer=single_buffer,
                        vmem_limit=vmem_limit)


# ----------------------------------------------------------------------------------
# Params / reference
# ----------------------------------------------------------------------------------
def init_params(key):
    ks = jax.random.split(key, 7)
    scale = 0.05
    w1 = scale * jax.random.normal(ks[0], (N_CHARS, DIM), jnp.float32)
    b1 = scale * jax.random.normal(ks[1], (1, DIM), jnp.float32)
    wres = scale * jax.random.normal(ks[2], (N_CONVS, KSIZE, DIM, DIM), jnp.float32)
    bres = scale * jax.random.normal(ks[3], (N_CONVS, 1, DIM), jnp.float32)
    # nn.Linear(SEQ_LEN*DIM, 1) weight; PyTorch flat index = c * SEQ_LEN + l (channel-major)
    wlin_flat = scale * jax.random.normal(ks[4], (DIM * SEQ_LEN,), jnp.float32)
    blin = scale * jax.random.normal(ks[5], (1, 1), jnp.float32)
    wlin_kernel = wlin_flat.reshape(DIM, SEQ_LEN).T     # channels-last (SEQ_LEN, DIM) layout
    return {"w1": w1, "b1": b1, "wres": wres, "bres": bres,
            "wlin_flat": wlin_flat, "wlin_kernel": wlin_kernel, "blin": blin}


def reference_forward(x, p, matmul_dtype=jnp.float32):
    """Pure-JAX reference matching PyTorch semantics (channels-first flatten).

    matmul_dtype reproduces the kernel's bf16 matmul-operand rounding (accumulation
    stays f32) so the bf16 fast path can be checked tightly."""
    B = x.shape[0]
    y = x.astype(jnp.float32) @ p["w1"] + p["b1"]                   # (B, L, DIM)

    def conv5(h, w, b):
        hp = jnp.pad(h, ((0, 0), (PAD, PAD), (0, 0)))
        out = sum(jnp.einsum("blc,cd->bld",
                             hp[:, k:k + SEQ_LEN].astype(matmul_dtype),
                             w[k].astype(matmul_dtype),
                             preferred_element_type=jnp.float32)
                  for k in range(KSIZE))
        return out + b

    for i in range(N_RESBLOCKS):
        h = conv5(jax.nn.relu(y), p["wres"][2 * i], p["bres"][2 * i])
        h = conv5(jax.nn.relu(h), p["wres"][2 * i + 1], p["bres"][2 * i + 1])
        y = y + 0.3 * h
    # PyTorch output before view is (B, DIM, SEQ_LEN); view(-1, SEQ_LEN*DIM) is channel-major
    flat = jnp.transpose(y, (0, 2, 1)).reshape(B, -1)
    return flat @ p["wlin_flat"][:, None] + p["blin"]


if __name__ == "__main__":
    key = jax.random.PRNGKey(0)
    pkey, xkey = jax.random.split(key)
    params = init_params(pkey)

    B = 32   # tb=16 -> 2 grid steps on v6e/v7x (both v7x TensorCores busy); tb=8 -> 4 on v5e
    # module input: (batch, SEQ_LEN, n_chars) (e.g. one-hot-ish character scores)
    x = jax.random.normal(xkey, (B, SEQ_LEN, N_CHARS), jnp.float32)

    # f32 matmul path: exact PyTorch-semantics check.
    out_f32 = jax.block_until_ready(
        discriminator_forward(x, params, matmul_dtype=jnp.float32))
    ref_f32 = reference_forward(x, params, matmul_dtype=jnp.float32)
    assert out_f32.shape == (B, 1)
    assert jnp.allclose(out_f32, ref_f32, rtol=1e-3, atol=1e-3), (out_f32, ref_f32)

    # bf16 matmul-operand fast path (default): checked against a reference that applies
    # the same operand rounding (accumulation is f32 in both).
    out_bf16 = jax.block_until_ready(
        discriminator_forward(x, params, matmul_dtype=jnp.bfloat16))
    ref_bf16 = reference_forward(x, params, matmul_dtype=jnp.bfloat16)
    assert out_bf16.shape == (B, 1)
    assert jnp.allclose(out_bf16, ref_bf16, rtol=5e-3, atol=5e-3), (out_bf16, ref_bf16)

    print("KERNEL_OK")
</pallas_src>

<mosaic_0001>
module attributes {stable_mosaic.version = 11 : i64} {
  func.func @probe_kernel(%arg0: memref<16x128xf32, #tpu.memory_space<vmem>>, %arg1: memref<16x128xf32, #tpu.memory_space<vmem>>) attributes {dimension_semantics = [], scalar_prefetch = 0 : i64, scratch_operands = 0 : i64, tpu.core_type = #tpu.core_type<tc>} {
    %c0 = arith.constant 0 : index
    %c0_0 = arith.constant 0 : index
    %0 = vector.load %arg0[%c0, %c0_0] : memref<16x128xf32, #tpu.memory_space<vmem>>, vector<16x128xf32>
    %c3_i32 = arith.constant 3 : i32
    %1 = tpu.dynamic_rotate %0 by %c3_i32 dim 0 : vector<16x128xf32>, i32 -> vector<16x128xf32>
    %c0_1 = arith.constant 0 : index
    %c0_2 = arith.constant 0 : index
    %2 = vector.load %arg1[%c0_1, %c0_2] : memref<16x128xf32, #tpu.memory_space<vmem>>, vector<16x128xf32>
    tpu.vector_store %arg1[%c0_1, %c0_2], %1 {strides = array<i32>} : memref<16x128xf32, #tpu.memory_space<vmem>>, vector<16x128xf32>,
    return
  }
}

</mosaic_0001>

<bundles_post_ra>
// kernel: tpu_custom_call.1
= control target key start
LH: loop header
LB: loop body
LE: loop exit
PB: predicated region body
PF: predicated region fallthrough
CT: control target
= control target key end

     0   :  { %6 = vsyncpa [#allocation3], 0  ;;  %s147_s0 = inlined_call_operand.hbm [shape: f32[16,128], index: 0, kind: input, shape index: {}]   ;;  %s148_s1 = inlined_call_operand.hbm [shape: f32[16,128], index: 1, kind: output, shape index: {}]  }
   0x1   :  { %7 = vsyncpa [#allocation4], 0  ;;  %s103_s6 = smov [#allocation2]   ;;  %s55_s10 = scalar_lea.hbm %s147_s0, 256 }
   0x2   :  { %s13_s7 = sshll.u32 %s103_s6, 4  ;;  %p56_p0 = scmp.ne.s32.totalorder %s147_s0, %s55_s10  ;;  %s14_s7 = int_to_ptr.vmem [resolvable:$true] %s13_s7 }
   0x3   :  { %p59_p1 = scmp.lt.u32.totalorder %s55_s10, %s147_s0 }
   0x5   :  { %p61_p2 = pnand %p59_p1, %p56_p0 }
   0x7   :  { %64 = shalt.err (!%p61_p2)
}
   0x8   :  { %s65_s15 = scalar_lea.vmem %s14_s7, 256  ;;  %p70_p4 = scmp.lt.s32.totalorder %s14_s7, %s14_s7 }
   0x9   :  { %p66_p3 = scmp.ne.s32.totalorder %s14_s7, %s65_s15  ;;  %p71_p5 = scmp.lt.s32.totalorder %s65_s15, %s65_s15 }
   0xb   :  { %p72_p6 = por %p71_p5, %p70_p4 }
   0xd   :  { %p73_p7 = pnand %p72_p6, %p66_p3 }
   0xf   :  { %76 = shalt.err (!%p73_p7)
}
  0x10   :  { %s104_s16 = smov 128   ;;  %s105_s17 = smov 8  }
  0x11   :  { %19 = dma.hbm_to_vmem [thread:$0]  %s147_s0, 256, %s14_s7, [#allocation3], %s104_s16, %s104_s16, %s105_s17  }
  0x12   :  { %99 = dma.done.wait [#allocation3], 256  }
  0x13   :  { %100 = vsyncadd [#allocation3], 4294967040  ;;  %v27_v0 = vlaneseq  ;;  %s106_s20 = smov [#allocation5]   ;;  %v23_v2 = vld [vmem:[#allocation2] sm:$0xff]  ;;  %v24_v3 = vld [vmem:[#allocation2 + $0x8] sm:$0xff] }
  0x14   :  { %s39_s21 = sshll.u32 %s106_s20, 4  ;;  %v25_v4 = vrot.slane %v23_v2, 5  ;;  %v26_v5 = vrot.slane %v24_v3, 5  ;;  %s40_s21 = int_to_ptr.vmem [resolvable:$true] %s39_s21 }
  0x15   :  { %v28_v1 = vshrl.u32 %v27_v0, 7  ;;  %s77_s22 = scalar_lea.vmem %s40_s21, 256  ;;  %p82_p9 = scmp.lt.s32.totalorder %s40_s21, %s40_s21 }
  0x16   :  { %p78_p8 = scmp.ne.s32.totalorder %s40_s21, %s77_s22  ;;  %p83_p10 = scmp.lt.s32.totalorder %s77_s22, %s77_s22 }
  0x17   :  { %vm29_vm0 = vcmp.lt.s32.totalorder %v28_v1, 3 }
  0x18   :  { %v31_v6 = vsel %vm29_vm0, %v26_v5, %v25_v4  ;;  %v30_v7 = vsel %vm29_vm0, %v25_v4, %v26_v5  ;;  %p84_p11 = por %p83_p10, %p82_p9 }
  0x19   :  { %32 = vst [vmem:[#allocation5] sm:$0xff] %v31_v6  ;;  %33 = vst [vmem:[#allocation5 + $0x8] sm:$0xff] %v30_v7 }
  0x1a   :  { %p85_p12 = pnand %p84_p11, %p78_p8 }
  0x1c   :  { %88 = shalt.err (!%p85_p12)
}
  0x1d   :  { %s89_s24 = scalar_lea.hbm %s148_s1, 256 }
  0x1e   :  { %p90_p13 = scmp.ne.s32.totalorder %s148_s1, %s89_s24  ;;  %p93_p0 = scmp.lt.u32.totalorder %s89_s24, %s148_s1 }
  0x20   :  { %p95_p1 = pnand %p93_p0, %p90_p13 }
  0x22   :  { %98 = shalt.err (!%p95_p1)
}
  0x23   :  { %45 = dma.vmem_to_hbm [thread:$0]  %s40_s21, 256, %s148_s1, [#allocation4], %s104_s16, %s104_s16, %s105_s17  }
  0x24   :  { %101 = dma.done.wait [#allocation4], 256  }
  0x25   :  { %102 = vsyncadd [#allocation4], 4294967040 }
  0x26   :  { %49 = vsyncpa [#allocation3], 1 }
  0x27   :  { %50 = vsyncpa [#allocation4], 1 }

</bundles_post_ra>
